<compile_context>
chip_gen: v7x
topology: tpu7x:2x2x1
jax: 0.10.0
libtpu: 0.0.40
codegen_flags: <defaults>
</compile_context>

<pallas_src>
import functools

import jax
import jax.numpy as jnp
from jax import lax
from jax.experimental import pallas as pl
from jax.experimental.pallas import tpu as pltpu

IN_DIM = 2
HIDDEN = 10
OUT_DIM = 4

H_PAD = 16          # hidden 10 -> 16 (sublane-friendly; zero padding is exact)
LANE = 128
CHUNK_B = 1024      # inner lane-chunk: keeps [16, chunk] intermediates in vregs

# Packed-parameter layout inside the single resident [H_PAD, P_COLS] f32 block.
_W1_C0 = 0          # [:,  0:2 ]  W1^T  (hid x in)
_B1_C0 = 2          # [:,  2:3 ]  b1    (hid x 1)
_B2_C0 = 3          # [:,  3:4 ]  b2    (hid x 1)
_B3_C0 = 4          # [:4, 4:5 ]  b3    (out x 1)
_W2_C0 = 16         # [:, 16:32]  W2^T  (hid x hid)
_W3_C0 = 32         # [:4,32:48]  W3^T  (out x hid)
P_COLS = 48


def _mlp_kernel(x_ref, p_ref, o_ref, *, chunk, n_chunks):
    """x_ref: [in, TILE_B]   p_ref: [H_PAD, P_COLS]   o_ref: [out, TILE_B]."""
    in_dim = x_ref.shape[0]
    hid = p_ref.shape[0]
    out_dim = o_ref.shape[0]

    # Static slices of the resident packed-parameter block (tiny, live in vregs).
    w1t = p_ref[:, _W1_C0:_W1_C0 + in_dim]             # [hid, in]
    b1 = p_ref[:, _B1_C0:_B1_C0 + 1]                   # [hid, 1]
    b2 = p_ref[:, _B2_C0:_B2_C0 + 1]                   # [hid, 1]
    w2t = p_ref[:, _W2_C0:_W2_C0 + hid]                # [hid, hid]
    w3t = p_ref[0:out_dim, _W3_C0:_W3_C0 + hid]        # [out, hid]
    b3 = p_ref[0:out_dim, _B3_C0:_B3_C0 + 1]           # [out, 1]

    def compute_chunk(c0):
        xc = x_ref[:, pl.ds(c0, chunk)]                # [in, chunk]  lane-dense
        # Layer 1: in_dim is tiny (2) -> broadcast FMAs on the VPU (free slot)
        # instead of a K=2 MXU matmul.
        h1 = b1
        for k in range(in_dim):
            h1 = h1 + w1t[:, k:k + 1] * xc[k:k + 1, :]
        h1 = jnp.maximum(h1, 0.0)                      # [hid, chunk]
        # Layer 2 on the MXU.
        h2 = jnp.dot(w2t, h1, preferred_element_type=jnp.float32) + b2
        h2 = jnp.maximum(h2, 0.0)                      # [hid, chunk]
        # Layer 3 -> lane-dense [out, chunk] store (unmasked vst).
        out = jnp.dot(w3t, h2, preferred_element_type=jnp.float32) + b3
        o_ref[:, pl.ds(c0, chunk)] = out.astype(o_ref.dtype)

    if n_chunks == 1:
        compute_chunk(0)
    else:
        def body(j, carry):
            compute_chunk(pl.multiple_of(j * chunk, LANE))
            return carry
        lax.fori_loop(0, n_chunks, body, 0)


def _round_up(n, m):
    return (n + m - 1) // m * m


def pack_params(params):
    """Pack the six PyTorch-style tensors (W[in,out], b[1,out]) into one [16, 48] block."""
    p = jnp.zeros((H_PAD, P_COLS), jnp.float32)
    p = p.at[:HIDDEN, _W1_C0:_W1_C0 + IN_DIM].set(params["w1"].T.astype(jnp.float32))
    p = p.at[:HIDDEN, _B1_C0:_B1_C0 + 1].set(params["b1"].T.astype(jnp.float32))
    p = p.at[:HIDDEN, _B2_C0:_B2_C0 + 1].set(params["b2"].T.astype(jnp.float32))
    p = p.at[:OUT_DIM, _B3_C0:_B3_C0 + 1].set(params["b3"].T.astype(jnp.float32))
    p = p.at[:HIDDEN, _W2_C0:_W2_C0 + HIDDEN].set(params["w2"].T.astype(jnp.float32))
    p = p.at[:OUT_DIM, _W3_C0:_W3_C0 + HIDDEN].set(params["w3"].T.astype(jnp.float32))
    return p


def _default_tile_cap():
    # Per-generation batch-tile cap.  Double-buffered in+out VMEM blocks cost
    # ~128*tb bytes (rows pad to 8 sublanes):  64K lanes ~ 8 MiB (fits v7x's 64 MiB
    # physical and every default scoped budget), 128K lanes ~ 16 MiB (fine on the
    # 128-MiB-VMEM v5e/v6e parts).  Both amortize the ~0.35us/grid-step fixed cost.
    try:
        vmem_bytes = pltpu.get_tpu_info().vmem_capacity_bytes
    except Exception:
        vmem_bytes = 64 << 20
    return 131072 if vmem_bytes >= (96 << 20) else 65536


def _choose_tiling(batch, tile_b):
    cap = tile_b if tile_b is not None else _default_tile_cap()
    cap = max(LANE, _round_up(cap, CHUNK_B))
    b128 = _round_up(max(batch, 1), LANE)
    if b128 <= CHUNK_B:
        tb = b128
        chunk = tb
    else:
        tb = min(cap, _round_up(batch, CHUNK_B))
        chunk = CHUNK_B
    return tb, chunk, tb // chunk


def auto_park_two_layer_fmajor(x_fm, packed, *, tile_b=None):
    """Feature-major fast path: x_fm [in_dim, batch] -> [out_dim, batch] (no wrapper
    relayout passes — use this when the surrounding model keeps [feat, batch] layout)."""
    in_dim, batch = x_fm.shape
    tb, chunk, n_chunks = _choose_tiling(batch, tile_b)
    b_pad = _round_up(batch, tb)
    if b_pad != batch:
        # Zero columns are matmul/ReLU-safe; their outputs are sliced off below.
        x_fm = jnp.zeros((in_dim, b_pad), x_fm.dtype).at[:, :batch].set(x_fm)

    kernel = functools.partial(_mlp_kernel, chunk=chunk, n_chunks=n_chunks)
    out = pl.pallas_call(
        kernel,
        out_shape=jax.ShapeDtypeStruct((OUT_DIM, b_pad), jnp.float32),
        grid=(b_pad // tb,),
        in_specs=[
            # x tile, batch on the lane axis (2 == full dim, tb % 128 == 0 -> legal).
            pl.BlockSpec((in_dim, tb), lambda i: (0, i)),
            # Packed params: constant index_map -> resident in VMEM across all steps.
            pl.BlockSpec((H_PAD, P_COLS), lambda i: (0, 0)),
        ],
        out_specs=pl.BlockSpec((OUT_DIM, tb), lambda i: (0, i)),
        compiler_params=pltpu.CompilerParams(
            # Batch tiles are independent.
            # TODO(synk): on v7x verify both TensorCores are busy; switch to
            # pltpu.CORE_PARALLEL (or an explicit per-core leading grid axis) if
            # plain "parallel" does not actually shard across the 2 TCs.
            dimension_semantics=("parallel",),
            vmem_limit_bytes=32 << 20,
        ),
    )(x_fm, packed)
    return out[:, :batch] if b_pad != batch else out


@functools.partial(jax.jit, static_argnames=("tile_b",))
def auto_park_two_layer(x, params, *, tile_b=None):
    """PyTorch-contract entry point: x [batch, in_dim] -> [batch, out_dim] float32.

    The transpose-in / transpose-out here are the only wrapper passes left; they are
    mandated by the batch-major contract and kept out of the kernel so its stores stay
    lane-dense.  jit keeps them fused right next to the pallas call.
    """
    packed = pack_params(params)
    out_fm = auto_park_two_layer_fmajor(x.T.astype(jnp.float32), packed, tile_b=tile_b)
    return out_fm.T


def init_params(key, in_dim=IN_DIM, hidden_dim=HIDDEN, out_dim=OUT_DIM):
    """Deterministic init mimicking nn.Linear's uniform(-1/sqrt(fan_in), 1/sqrt(fan_in))."""
    ks = jax.random.split(key, 6)

    def lin(kw, kb, fan_in, fan_out):
        bound = 1.0 / jnp.sqrt(fan_in)
        w = jax.random.uniform(kw, (fan_in, fan_out), jnp.float32, -bound, bound)
        b = jax.random.uniform(kb, (1, fan_out), jnp.float32, -bound, bound)
        return w, b

    w1, b1 = lin(ks[0], ks[1], in_dim, hidden_dim)
    w2, b2 = lin(ks[2], ks[3], hidden_dim, hidden_dim)
    w3, b3 = lin(ks[4], ks[5], hidden_dim, out_dim)
    return dict(w1=w1, b1=b1, w2=w2, b2=b2, w3=w3, b3=b3)


def _reference(x, p):
    h1 = jnp.maximum(x @ p["w1"] + p["b1"], 0.0)
    h2 = jnp.maximum(h1 @ p["w2"] + p["b2"], 0.0)
    return h2 @ p["w3"] + p["b3"]


if __name__ == "__main__":
    key = jax.random.PRNGKey(0)
    k_p, k1, k2, k3 = jax.random.split(key, 4)
    params = init_params(k_p)

    # Small batch: single 128-lane tile, single chunk.
    x1 = jax.random.normal(k1, (8, IN_DIM), jnp.float32)
    o1 = jax.block_until_ready(auto_park_two_layer(x1, params))
    assert o1.shape == (8, OUT_DIM)
    assert jnp.allclose(o1, _reference(x1, params), atol=1e-5, rtol=1e-5)

    # Ragged batch exercising the inner chunk loop (tb=3072, 3 chunks) + lane padding.
    x2 = jax.random.normal(k2, (3000, IN_DIM), jnp.float32)
    o2 = jax.block_until_ready(auto_park_two_layer(x2, params))
    assert o2.shape == (3000, OUT_DIM)
    assert jnp.allclose(o2, _reference(x2, params), atol=1e-5, rtol=1e-5)

    # Multi-grid-step path (tile_b override -> grid=3, 2 chunks/step, padded tail tile).
    x3 = jax.random.normal(k3, (4500, IN_DIM), jnp.float32)
    o3 = jax.block_until_ready(auto_park_two_layer(x3, params, tile_b=2048))
    assert o3.shape == (4500, OUT_DIM)
    assert jnp.allclose(o3, _reference(x3, params), atol=1e-5, rtol=1e-5)

    print("KERNEL_OK")
</pallas_src>

<mosaic_0001>
module attributes {stable_mosaic.version = 11 : i64} {
  func.func @_mlp_kernel(%arg0: i32, %arg1: memref<2x128xf32, #tpu.memory_space<vmem>>, %arg2: memref<16x48xf32, #tpu.memory_space<vmem>>, %arg3: memref<4x128xf32, #tpu.memory_space<vmem>>) attributes {dimension_semantics = [#tpu.dimension_semantics<parallel>], iteration_bounds = array<i64: 1>, scalar_prefetch = 0 : i64, scratch_operands = 0 : i64, tpu.core_type = #tpu.core_type<tc>, window_params = [{transform_indices = @transform_0, window_bounds = array<i64: 2, 128>}, {pipeline_mode = #tpu.pipeline_mode<synchronous>, transform_indices = @transform_1, window_bounds = array<i64: 16, 48>}, {transform_indices = @transform_2, window_bounds = array<i64: 4, 128>}]} {
    %c0 = arith.constant 0 : index
    %c0_0 = arith.constant 0 : index
    %0 = vector.load %arg2[%c0, %c0_0] : memref<16x48xf32, #tpu.memory_space<vmem>>, vector<16x2xf32>
    %c0_1 = arith.constant 0 : index
    %c2 = arith.constant 2 : index
    %1 = vector.load %arg2[%c0_1, %c2] : memref<16x48xf32, #tpu.memory_space<vmem>>, vector<16x1xf32>
    %c0_2 = arith.constant 0 : index
    %c3 = arith.constant 3 : index
    %2 = vector.load %arg2[%c0_2, %c3] : memref<16x48xf32, #tpu.memory_space<vmem>>, vector<16x1xf32>
    %c0_3 = arith.constant 0 : index
    %c16 = arith.constant 16 : index
    %3 = vector.load %arg2[%c0_3, %c16] : memref<16x48xf32, #tpu.memory_space<vmem>>, vector<16x16xf32>
    %c0_4 = arith.constant 0 : index
    %c32 = arith.constant 32 : index
    %4 = vector.load %arg2[%c0_4, %c32] : memref<16x48xf32, #tpu.memory_space<vmem>>, vector<4x16xf32>
    %c0_5 = arith.constant 0 : index
    %c4 = arith.constant 4 : index
    %5 = vector.load %arg2[%c0_5, %c4] : memref<16x48xf32, #tpu.memory_space<vmem>>, vector<4x1xf32>
    %c0_6 = arith.constant 0 : index
    %c0_7 = arith.constant 0 : index
    %6 = vector.load %arg1[%c0_6, %c0_7] : memref<2x128xf32, #tpu.memory_space<vmem>>, vector<2x128xf32>
    %7 = vector.extract_strided_slice %0 {offsets = [0, 0], sizes = [16, 1], strides = [1, 1]} : vector<16x2xf32> to vector<16x1xf32>
    %8 = vector.extract_strided_slice %6 {offsets = [0, 0], sizes = [1, 128], strides = [1, 1]} : vector<2x128xf32> to vector<1x128xf32>
    %9 = vector.broadcast %7 : vector<16x1xf32> to vector<16x128xf32>
    %10 = vector.broadcast %8 : vector<1x128xf32> to vector<16x128xf32>
    %11 = arith.mulf %9, %10 : vector<16x128xf32>
    %12 = vector.broadcast %1 : vector<16x1xf32> to vector<16x128xf32>
    %13 = arith.addf %12, %11 : vector<16x128xf32>
    %14 = vector.extract_strided_slice %0 {offsets = [0, 1], sizes = [16, 1], strides = [1, 1]} : vector<16x2xf32> to vector<16x1xf32>
    %15 = vector.extract_strided_slice %6 {offsets = [1, 0], sizes = [1, 128], strides = [1, 1]} : vector<2x128xf32> to vector<1x128xf32>
    %16 = vector.broadcast %14 : vector<16x1xf32> to vector<16x128xf32>
    %17 = vector.broadcast %15 : vector<1x128xf32> to vector<16x128xf32>
    %18 = arith.mulf %16, %17 : vector<16x128xf32>
    %19 = arith.addf %13, %18 : vector<16x128xf32>
    %cst = arith.constant 0.000000e+00 : f32
    %20 = vector.broadcast %cst : f32 to vector<16x128xf32>
    %21 = arith.maximumf %19, %20 : vector<16x128xf32>
    %cst_8 = arith.constant dense<0.000000e+00> : vector<16x128xf32>
    %22 = tpu.matmul %3, %21, %cst_8 {dimension_numbers = #tpu.dot_dimension_numbers<[1], [0], [0], [1], [0, 0, 1, 1], [], []>} : vector<16x16xf32>, vector<16x128xf32>, vector<16x128xf32> -> vector<16x128xf32>
    %23 = vector.broadcast %2 : vector<16x1xf32> to vector<16x128xf32>
    %24 = arith.addf %22, %23 : vector<16x128xf32>
    %cst_9 = arith.constant 0.000000e+00 : f32
    %25 = vector.broadcast %cst_9 : f32 to vector<16x128xf32>
    %26 = arith.maximumf %24, %25 : vector<16x128xf32>
    %cst_10 = arith.constant dense<0.000000e+00> : vector<4x128xf32>
    %27 = tpu.matmul %4, %26, %cst_10 {dimension_numbers = #tpu.dot_dimension_numbers<[1], [0], [0], [1], [0, 0, 1, 1], [], []>} : vector<4x16xf32>, vector<16x128xf32>, vector<4x128xf32> -> vector<4x128xf32>
    %28 = vector.broadcast %5 : vector<4x1xf32> to vector<4x128xf32>
    %29 = arith.addf %27, %28 : vector<4x128xf32>
    %c0_11 = arith.constant 0 : index
    %c0_12 = arith.constant 0 : index
    %30 = vector.load %arg3[%c0_11, %c0_12] : memref<4x128xf32, #tpu.memory_space<vmem>>, vector<4x128xf32>
    tpu.vector_store %arg3[%c0_11, %c0_12], %29 {strides = array<i32>} : memref<4x128xf32, #tpu.memory_space<vmem>>, vector<4x128xf32>,
    return
  }
  func.func @transform_0(%arg0: i32) -> (i32, i32) {
    %c0_i32 = arith.constant 0 : i32
    %c0_i32_0 = arith.constant 0 : i32
    return %c0_i32, %arg0 : i32, i32
  }
  func.func @transform_1(%arg0: i32) -> (i32, i32) {
    %c0_i32 = arith.constant 0 : i32
    %c0_i32_0 = arith.constant 0 : i32
    %c0_i32_1 = arith.constant 0 : i32
    return %c0_i32, %c0_i32_0 : i32, i32
  }
  func.func @transform_2(%arg0: i32) -> (i32, i32) {
    %c0_i32 = arith.constant 0 : i32
    %c0_i32_0 = arith.constant 0 : i32
    return %c0_i32, %arg0 : i32, i32
  }
}

</mosaic_0001>

<bundles_post_ra>
// kernel: auto_park_two_layer.1
= control target key start
LH: loop header
LB: loop body
LE: loop exit
PB: predicated region body
PF: predicated region fallthrough
CT: control target
= control target key end

     0   :  { %v286_v0 = vmov 2   ;;  %v287_v1 = vmov 0   ;;  %v288_v4 = vmov 1   ;;  %s289_s13 = smov 112   ;;  %v290_v5 = vmov 3   ;;  %s291_s16 = smov 96   ;;  %s329_s1 = inlined_call_operand.vmem [shape: f32[16,48], index: 1, kind: input, shape index: {}]   ;;  %s330_s0 = inlined_call_operand.vmem [shape: f32[2,128], index: 0, kind: input, shape index: {}]   ;;  %s331_s2 = inlined_call_operand.vmem [shape: f32[4,128], index: 2, kind: output, shape index: {}]  }
   0x1   :  { %279 = vset.pattern.permute.xlu1 %v286_v0  ;;  %278 = vset.pattern.permute.xlu0 %v287_v1  ;;  %v11_v2 = vld [vmem:[%s329_s1] sm:$0xff]  ;;  %v12_v3 = vld [vmem:[%s329_s1 + $0x8] sm:$0xff]  ;;  %v25_v7 = vlaneseq  ;;  %vm71_vm0 = vcmask 130048   ;;  %v292_v33 = vmov 0.0|0.0   ;;  %vm293_vm1 = vmmov 0  }
   0x2   :  { %32 = vperm.xlu1 %279, %v11_v2   ;;  %17 = vperm.xlu0 %278, %v11_v2   ;;  %v13_v6 = vld [vmem:[%s329_s1] sm:$0xf]  ;;  %v294_v34 = vmov 0.0   ;;  %v295_v35 = vmov 4  }
   0x3   :  { %v26_v8 = vshrl.u32 %v25_v7, 7  ;;  %v14_v10 = vld [vmem:[%s330_s0] sm:$0x3]  ;;  %265 = vmatprep.subr.bf16.mxu1 %v292_v33  ;;  %258 = vmatprep.mubr.msk.f32.mxu1 %vm293_vm1, %v294_v34 }
   0x5   :  { %v27_v9 = vsub.s32 0, %v26_v8  ;;  %v51_v14 = vsub.s32 1, %v26_v8 }
   0x6   :  { %36 = vperm.xlu1 %279, %v12_v3   ;;  %22 = vperm.xlu0 %278, %v12_v3  }
   0x7   :  { %v28_v13 = vrot.slane %v14_v10, %v27_v9  ;;  %v52_v19 = vrot.slane %v14_v10, %v51_v14 }
   0xa   :  { %281 = vset.pattern.permute.xlu1 %v288_v4  ;;  %280 = vset.pattern.permute.xlu0 %v288_v4 }
   0xb   :  { %46 = vperm.xlu1 %281, %v12_v3   ;;  %42 = vperm.xlu0 %280, %v11_v2  }
   0xf   :  { %67 = vrot.lane.b32.xlu1 %v11_v2, %s289_s13  ;;  %69 = vrot.lane.b32.xlu0 %v12_v3, %s289_s13 }
  0x10   :  { %283 = vset.pattern.permute.xlu0 %v290_v5  ;;  %282 = vset.pattern.permute.xlu1 %v290_v5 }
  0x13   :  { %64 = vperm.xlu0 %283, %v12_v3   ;;  %60 = vperm.xlu1 %282, %v11_v2  }
  0x17   :  { %158 = vrot.lane.b32.xlu1 %v13_v6, %s291_s16  ;;  %285 = vset.pattern.permute.xlu0 %v295_v35 }
  0x18   :  { %284 = vset.pattern.permute.xlu1 %v295_v35 }
  0x1b   :  { %155 = vperm.xlu1 %284, %v13_v6  }
  0x81   :  { %v33_v11 = vpop.permute.xlu1 %32  ;;  %v18_v12 = vpop.permute.xlu0 %17 }
  0x82   :  { %v29_v17 = vmul.f32 %v28_v13, %v18_v12 }
  0x84   :  { %v39_v22 = vadd.f32 %v33_v11, %v29_v17 }
  0x85   :  { %v37_v15 = vpop.permute.xlu1 %36  ;;  %v23_v16 = vpop.permute.xlu0 %22 }
  0x86   :  { %v30_v18 = vmul.f32 %v28_v13, %v23_v16 }
  0x88   :  { %v40_v23 = vadd.f32 %v37_v15, %v30_v18 }
  0x8a   :  { %v47_v20 = vpop.permute.xlu1 %46  ;;  %v43_v21 = vpop.permute.xlu0 %42 }
  0x8b   :  { %v54_v24 = vmul.f32 %v52_v19, %v47_v20  ;;  %v53_v25 = vmul.f32 %v52_v19, %v43_v21 }
  0x8d   :  { %v56_v26 = vadd.f32 %v54_v24, %v40_v23  ;;  %v55_v27 = vadd.f32 %v53_v25, %v39_v22 }
  0x8e   :  { %v68_v28 = vpop.permute.xlu1 %67  ;;  %v70_v32 = vpop.permute.xlu0 %69 }
  0x8f   :  { %v58_v29 = vmax.f32 %v56_v26, 0.0  ;;  %v57_v30 = vmax.f32 %v55_v27, 0.0  ;;  %251 = vmatprep.mubr.msk.f32.mxu0 %vm71_vm0, %v68_v28 }
  0x91   :  { %v261_v31 = vpack.c.bf16 %v58_v29, %v57_v30 }
  0x92   :  { %v65_v36 = vpop.permute.xlu0 %64  ;;  %v61_v37 = vpop.permute.xlu1 %60 }
  0x93   :  { %262 = vmatprep.subr.bf16.mxu0 %v261_v31 }
  0x94   :  { %264 = vmatpush3.bf16.msra.mxu0 %v261_v31 }
  0x96   :  { %v159_v45 = vpop.permute.xlu1 %158 }
  0x97   :  { %252 = vmatmul.mubr.msk.f32.vlgmr.msra.gmra.mrb[0].mxu0 %vm71_vm0, %v70_v32 }
  0x9a   :  { %v156_v46 = vpop.permute.xlu1 %155 }
 0x16a   :  { %v253_v38 = vpop.f32.mrb[0].mxu0 }
 0x16b   :  { %v148_v39 = vadd.f32 %v253_v38, %v65_v36  ;;  %v142_v40 = vpop.f32.mrb[1].mxu0 }
 0x16c   :  { %v143_v41 = vadd.f32 %v142_v40, %v61_v37 }
 0x16d   :  { %v152_v42 = vmax.f32 %v148_v39, 0.0 }
 0x16e   :  { %v151_v43 = vmax.f32 %v143_v41, 0.0 }
 0x170   :  { %v266_v44 = vpack.c.bf16 %v152_v42, %v151_v43 }
 0x172   :  { %267 = vmatpush3.bf16.msra.mxu1 %v266_v44 }
 0x175   :  { %259 = vmatmul.mubr.msk.f32.vlgmr.msra.gmra.mrb[0].mxu1 %vm71_vm0, %v159_v45 }
 0x248   :  { %v228_v47 = vpop.f32.mrb[0].mxu1 }
 0x249   :  { %v229_v48 = vadd.f32 %v228_v47, %v156_v46  ;;  %v260_v49 = vpop.f32.mrb[1].mxu1 }
 0x24b   :  { %232 = vst [vmem:[%s331_s2] sm:$0xf] %v229_v48 }

</bundles_post_ra>
